<compile_context>
chip_gen: v7x
topology: tpu7x:2x2x1
jax: 0.10.0
libtpu: 0.0.40
codegen_flags: <defaults>
</compile_context>

<pallas_src>
import jax
import jax.numpy as jnp
from jax.experimental import pallas as pl
from jax.experimental.pallas import tpu as pltpu

HEAD_PAD = 128            # lane-dense width of the fused fc1|fc2 output slab
_MAX_TILE_M = 512         # >=512-row tiles reach ~85% of HBM roofline
_VMEM_BUDGET = 40 << 20   # keep working set well under v7x's 64 MiB/core


# ---------------------------------------------------------------------------
# Kernel: grid = (n_layers, n_row_tiles), layer axis outer (sequential).
# ---------------------------------------------------------------------------
def _cpgcn_kernel(adj_ref, x_ref, w0_ref, wl_ref, bl_ref, wh_ref, bh_ref,
                  out_ref, xw_ref, h_ref):
    l = pl.program_id(0)            # GCN layer index (sequential)
    i = pl.program_id(1)            # adjacency row-tile index
    n_layers = pl.num_programs(0)
    tile_m = adj_ref.shape[0]

    # ---- once per layer (first row tile): xw = h_{l-1} @ W_l into VMEM -----
    @pl.when((l == 0) & (i == 0))
    def _():
        xw_ref[...] = jnp.dot(
            x_ref[...], w0_ref[...],
            preferred_element_type=jnp.float32).astype(xw_ref.dtype)

    @pl.when((l > 0) & (i == 0))
    def _():
        # h_ref holds the FULL previous-layer activation (all row tiles of
        # layer l-1 ran before any tile of layer l).  It is read in full here,
        # before this layer's tiles start overwriting it below.
        xw_ref[...] = jnp.dot(
            h_ref[...], wl_ref[0],
            preferred_element_type=jnp.float32).astype(xw_ref.dtype)

    # ---- per row tile: adj_tile @ xw + b (fp32 accumulation) ---------------
    acc = jnp.dot(adj_ref[...], xw_ref[...],
                  preferred_element_type=jnp.float32) + bl_ref[0]

    @pl.when(l < n_layers - 1)
    def _():
        # ReLU between layers; dropout(p=0.5) is identity in eval mode.
        row0 = pl.multiple_of(i * tile_m, tile_m)
        h_ref[pl.ds(row0, tile_m), :] = jnp.maximum(acc, 0.0).astype(h_ref.dtype)

    @pl.when(l == n_layers - 1)
    def _():
        # Last GCN layer has no ReLU; fused heads: one MXU pass over
        # [fc1_w | fc2_w | zero-pad] -> lane-dense (tile_m, 128) store.
        head = jnp.dot(acc.astype(wh_ref.dtype), wh_ref[...],
                       preferred_element_type=jnp.float32) + bh_ref[...]
        out_ref[...] = head.astype(out_ref.dtype)


# ---------------------------------------------------------------------------
# Tiling / VMEM budgeting helpers.
# ---------------------------------------------------------------------------
def _vmem_bytes_estimate(n, tile_m, c_in, hidden):
    bf16, f32 = 2, 4
    est = 0
    est += 2 * tile_m * n * bf16           # adj row tile (double-buffered)
    est += 2 * tile_m * HEAD_PAD * f32     # output tile (double-buffered)
    est += 2 * n * c_in * bf16             # x (resident)
    est += 2 * c_in * hidden * bf16        # w0
    est += 2 * hidden * hidden * bf16      # current layer weight block
    est += 2 * hidden * f32                # current layer bias block
    est += 2 * hidden * HEAD_PAD * bf16    # fused head weights
    est += 2 * HEAD_PAD * f32              # fused head bias
    est += 2 * n * hidden * bf16           # xw + h VMEM scratches
    return est


def _pick_tile_m(n, c_in, hidden, budget=_VMEM_BUDGET):
    if n <= _MAX_TILE_M:
        return n                            # single tile == full array dims
    for t in (512, 256, 128, 64, 32, 16, 8):
        if n % t == 0 and _vmem_bytes_estimate(n, t, c_in, hidden) <= budget:
            return t
    return n                                # fallback: no row tiling


# ---------------------------------------------------------------------------
# Parameter packing (hoisted out of the per-call forward path).
# ---------------------------------------------------------------------------
def prepare_cpgcn_params(params):
    gcn = params["gcn"]
    n_layers = len(gcn)
    c_in, hidden = gcn[0][0].shape
    c1 = params["fc1_w"].shape[1]
    c2 = params["fc2_w"].shape[1]
    assert c1 + c2 <= HEAD_PAD

    w0 = gcn[0][0].astype(jnp.bfloat16)
    # Layers 1..L-1 weights stacked; slot 0 is an unused placeholder so the
    # kernel's weight BlockSpec index_map is simply the layer id.
    w_rest = jnp.zeros((n_layers, hidden, hidden), jnp.bfloat16)
    for l in range(1, n_layers):
        w_rest = w_rest.at[l].set(gcn[l][0].astype(jnp.bfloat16))
    b_all = jnp.stack([b for (_, b) in gcn], axis=0).astype(jnp.float32)

    # Fused heads: [fc1_w | fc2_w | zero-pad] -> lane-dense 128-wide slab.
    w_heads = jnp.zeros((hidden, HEAD_PAD), jnp.bfloat16)
    w_heads = w_heads.at[:, :c1].set(params["fc1_w"].astype(jnp.bfloat16))
    w_heads = w_heads.at[:, c1:c1 + c2].set(params["fc2_w"].astype(jnp.bfloat16))
    b_heads = jnp.zeros((1, HEAD_PAD), jnp.float32)
    b_heads = b_heads.at[:, :c1].set(params["fc1_b"])
    b_heads = b_heads.at[:, c1:c1 + c2].set(params["fc2_b"])

    return dict(w0=w0, w_rest=w_rest, b_all=b_all,
                w_heads=w_heads, b_heads=b_heads,
                n_layers=n_layers, hidden=hidden, c_in=c_in, c1=c1, c2=c2)


# ---------------------------------------------------------------------------
# Wrapper: one pallas_call for all GCN layers + both heads.
# ---------------------------------------------------------------------------
def cpgcn_forward(prepped, x, adj):
    n = x.shape[0]
    c_in = x.shape[1]
    hidden = prepped["hidden"]
    n_layers = prepped["n_layers"]
    c1, c2 = prepped["c1"], prepped["c2"]

    tile_m = _pick_tile_m(n, c_in, hidden)
    n_tiles = n // tile_m

    # Cast the large runtime operands to bf16 ONCE (halves their HBM traffic);
    # all matmuls accumulate in fp32 inside the kernel.
    adj_bf16 = adj.astype(jnp.bfloat16)
    x_bf16 = x.astype(jnp.bfloat16)

    def full(shape):
        return pl.BlockSpec(shape, lambda l, i, _s=len(shape): (0,) * _s)

    in_specs = [
        pl.BlockSpec((tile_m, n), lambda l, i: (i, 0)),           # adj row tile
        full(x_bf16.shape),                                       # x
        full(prepped["w0"].shape),                                # W_0
        pl.BlockSpec((1, hidden, hidden), lambda l, i: (l, 0, 0)),  # W_l
        pl.BlockSpec((1, 1, hidden), lambda l, i: (l, 0, 0)),       # b_l
        full(prepped["w_heads"].shape),                           # fused heads W
        full(prepped["b_heads"].shape),                           # fused heads b
    ]
    out_spec = pl.BlockSpec((tile_m, HEAD_PAD), lambda l, i: (i, 0))

    est = _vmem_bytes_estimate(n, tile_m, c_in, hidden)
    # Explicit scoped-VMEM limit (default 16/32 MiB is below physical); cap
    # below physical VMEM (v7x has only 64 MiB/core) with headroom.
    vmem_limit = min(max(int(est * 1.5) + (2 << 20), 32 << 20), 96 << 20)

    out = pl.pallas_call(
        _cpgcn_kernel,
        out_shape=jax.ShapeDtypeStruct((n, HEAD_PAD), jnp.float32),
        grid_spec=pltpu.PrefetchScalarGridSpec(
            num_scalar_prefetch=0,
            grid=(n_layers, n_tiles),
            in_specs=in_specs,
            out_specs=out_spec,
            scratch_shapes=[
                pltpu.VMEM((n, hidden), jnp.bfloat16),   # xw = h_{l-1} @ W_l
                pltpu.VMEM((n, hidden), jnp.bfloat16),   # layer activation h
            ],
        ),
        compiler_params=pltpu.CompilerParams(
            # Layer axis is sequential; the row-tile axis carries cross-tile
            # state via per-core VMEM scratches, so it must NOT be sharded
            # across v7x's two TensorCores -> both 'arbitrary'.
            dimension_semantics=("arbitrary", "arbitrary"),
            vmem_limit_bytes=vmem_limit,
        ),
    )(adj_bf16, x_bf16, prepped["w0"], prepped["w_rest"], prepped["b_all"],
      prepped["w_heads"], prepped["b_heads"])

    pred = out[:, :c1]
    pred_cluster = out[:, c1:c1 + c2]
    return pred, pred_cluster


# ---------------------------------------------------------------------------
# Parameters (deterministic Glorot-style init, matching the module layout).
# ---------------------------------------------------------------------------
def init_cpgcn_params(key, in_channels, hidden_channels, out_channels,
                      n_clusters, n_layers):
    dims = [in_channels] + [hidden_channels] * n_layers  # GCN output = hidden
    params = {"gcn": []}
    for l in range(n_layers):
        key, k = jax.random.split(key)
        fan_in, fan_out = dims[l], dims[l + 1]
        scale = jnp.sqrt(6.0 / (fan_in + fan_out))
        w = jax.random.uniform(k, (fan_in, fan_out), jnp.float32, -scale, scale)
        b = jnp.zeros((1, fan_out), jnp.float32)
        params["gcn"].append((w, b))
    key, k1, k2 = jax.random.split(key, 3)
    s1 = jnp.sqrt(6.0 / (hidden_channels + out_channels))
    s2 = jnp.sqrt(6.0 / (hidden_channels + n_clusters))
    params["fc1_w"] = jax.random.uniform(
        k1, (hidden_channels, out_channels), jnp.float32, -s1, s1)
    params["fc1_b"] = jnp.zeros((1, out_channels), jnp.float32)
    params["fc2_w"] = jax.random.uniform(
        k2, (hidden_channels, n_clusters), jnp.float32, -s2, s2)
    params["fc2_b"] = jnp.zeros((1, n_clusters), jnp.float32)
    return params


# Pure-JAX fp32 reference for sanity checking.
def cpgcn_forward_ref(params, x, adj):
    n_layers = len(params["gcn"])
    h = x
    for l, (w, b) in enumerate(params["gcn"]):
        h = adj @ (h @ w) + b
        if l != n_layers - 1:
            h = jnp.maximum(h, 0.0)
    pred = h @ params["fc1_w"] + params["fc1_b"]
    clus = h @ params["fc2_w"] + params["fc2_b"]
    return pred, clus


# ---------------------------------------------------------------------------
if __name__ == "__main__":
    N = 16                # number of graph nodes
    IN_CHANNELS = 8
    HIDDEN_CHANNELS = 32
    OUT_CHANNELS = 4      # classes
    N_CLUSTERS = 3
    N_LAYERS = 5          # module default

    key = jax.random.PRNGKey(0)
    k_feat, k_adj, k_param = jax.random.split(key, 3)

    # Node features (N, C_in).
    x = jax.random.normal(k_feat, (N, IN_CHANNELS), jnp.float32)

    # Symmetrically-normalized adjacency A_hat = D^-1/2 (A + I) D^-1/2.
    a = (jax.random.uniform(k_adj, (N, N)) > 0.7).astype(jnp.float32)
    a = jnp.maximum(a, a.T) + jnp.eye(N, dtype=jnp.float32)
    deg = jnp.sum(a, axis=1)
    d_inv_sqrt = 1.0 / jnp.sqrt(deg)
    adj = a * d_inv_sqrt[:, None] * d_inv_sqrt[None, :]

    params = init_cpgcn_params(
        k_param, IN_CHANNELS, HIDDEN_CHANNELS, OUT_CHANNELS,
        N_CLUSTERS, N_LAYERS)
    prepped = prepare_cpgcn_params(params)   # weight packing hoisted to init

    pred, pred_cluster = cpgcn_forward(prepped, x, adj)
    jax.block_until_ready((pred, pred_cluster))

    # Verify against pure-JAX fp32 reference (tolerances loosened for the
    # bf16 MXU-input path; accumulation is fp32).
    pred_ref, clus_ref = cpgcn_forward_ref(params, x, adj)
    assert pred.shape == (N, OUT_CHANNELS)
    assert pred_cluster.shape == (N, N_CLUSTERS)
    assert jnp.allclose(pred, pred_ref, atol=5e-2, rtol=5e-2)
    assert jnp.allclose(pred_cluster, clus_ref, atol=5e-2, rtol=5e-2)

    print("KERNEL_OK")
</pallas_src>

<mosaic_0001>
module attributes {stable_mosaic.version = 11 : i64} {
  func.func @_cpgcn_kernel(%arg0: i32, %arg1: i32, %arg2: memref<16x16xbf16, #tpu.memory_space<vmem>>, %arg3: memref<16x8xbf16, #tpu.memory_space<vmem>>, %arg4: memref<8x32xbf16, #tpu.memory_space<vmem>>, %arg5: memref<1x32x32xbf16, #tpu.memory_space<vmem>>, %arg6: memref<1x1x32xf32, #tpu.memory_space<vmem>>, %arg7: memref<32x128xbf16, #tpu.memory_space<vmem>>, %arg8: memref<1x128xf32, #tpu.memory_space<vmem>>, %arg9: memref<16x128xf32, #tpu.memory_space<vmem>>, %arg10: memref<16x32xbf16, #tpu.memory_space<vmem>>, %arg11: memref<16x32xbf16, #tpu.memory_space<vmem>>) attributes {dimension_semantics = [#tpu.dimension_semantics<arbitrary>, #tpu.dimension_semantics<arbitrary>], iteration_bounds = array<i64: 5, 1>, scalar_prefetch = 0 : i64, scratch_operands = 2 : i64, tpu.core_type = #tpu.core_type<tc>, window_params = [{transform_indices = @transform_0, window_bounds = array<i64: 16, 16>}, {pipeline_mode = #tpu.pipeline_mode<synchronous>, transform_indices = @transform_1, window_bounds = array<i64: 16, 8>}, {pipeline_mode = #tpu.pipeline_mode<synchronous>, transform_indices = @transform_2, window_bounds = array<i64: 8, 32>}, {transform_indices = @transform_3, window_bounds = array<i64: 1, 32, 32>}, {transform_indices = @transform_4, window_bounds = array<i64: 1, 1, 32>}, {pipeline_mode = #tpu.pipeline_mode<synchronous>, transform_indices = @transform_5, window_bounds = array<i64: 32, 128>}, {pipeline_mode = #tpu.pipeline_mode<synchronous>, transform_indices = @transform_6, window_bounds = array<i64: 1, 128>}, {transform_indices = @transform_7, window_bounds = array<i64: 16, 128>}]} {
    %c0_i32 = arith.constant 0 : i32
    %0 = arith.cmpi eq, %arg0, %c0_i32 : i32
    %c0_i32_0 = arith.constant 0 : i32
    %1 = arith.cmpi eq, %arg1, %c0_i32_0 : i32
    %2 = arith.andi %0, %1 : i1
    %3 = arith.extui %2 : i1 to i32
    %c0_i32_1 = arith.constant 0 : i32
    %4 = arith.cmpi ne, %3, %c0_i32_1 : i32
    scf.if %4 {
      %c0_14 = arith.constant 0 : index
      %c0_15 = arith.constant 0 : index
      %23 = vector.load %arg3[%c0_14, %c0_15] : memref<16x8xbf16, #tpu.memory_space<vmem>>, vector<16x8xbf16>
      %c0_16 = arith.constant 0 : index
      %c0_17 = arith.constant 0 : index
      %24 = vector.load %arg4[%c0_16, %c0_17] : memref<8x32xbf16, #tpu.memory_space<vmem>>, vector<8x32xbf16>
      %cst_18 = arith.constant dense<0.000000e+00> : vector<16x32xf32>
      %25 = tpu.matmul %23, %24, %cst_18 {dimension_numbers = #tpu.dot_dimension_numbers<[1], [0], [0], [1], [0, 0, 1, 1], [], []>} : vector<16x8xbf16>, vector<8x32xbf16>, vector<16x32xf32> -> vector<16x32xf32>
      %26 = arith.truncf %25 : vector<16x32xf32> to vector<16x32xbf16>
      %c0_19 = arith.constant 0 : index
      %c0_20 = arith.constant 0 : index
      %27 = vector.load %arg10[%c0_19, %c0_20] : memref<16x32xbf16, #tpu.memory_space<vmem>>, vector<16x32xbf16>
      tpu.vector_store %arg10[%c0_19, %c0_20], %26 {strides = array<i32>} : memref<16x32xbf16, #tpu.memory_space<vmem>>, vector<16x32xbf16>,
    } else {
    }
    %c0_i32_2 = arith.constant 0 : i32
    %5 = arith.cmpi sgt, %arg0, %c0_i32_2 : i32
    %c0_i32_3 = arith.constant 0 : i32
    %6 = arith.cmpi eq, %arg1, %c0_i32_3 : i32
    %7 = arith.andi %5, %6 : i1
    %8 = arith.extui %7 : i1 to i32
    %c0_i32_4 = arith.constant 0 : i32
    %9 = arith.cmpi ne, %8, %c0_i32_4 : i32
    scf.if %9 {
      %c0_14 = arith.constant 0 : index
      %c0_15 = arith.constant 0 : index
      %23 = vector.load %arg11[%c0_14, %c0_15] : memref<16x32xbf16, #tpu.memory_space<vmem>>, vector<16x32xbf16>
      %c0_16 = arith.constant 0 : index
      %c0_17 = arith.constant 0 : index
      %c0_18 = arith.constant 0 : index
      %24 = vector.load %arg5[%c0_16, %c0_17, %c0_18] : memref<1x32x32xbf16, #tpu.memory_space<vmem>>, vector<1x32x32xbf16>
      %25 = vector.shape_cast %24 : vector<1x32x32xbf16> to vector<32x32xbf16>
      %cst_19 = arith.constant dense<0.000000e+00> : vector<16x32xf32>
      %26 = tpu.matmul %23, %25, %cst_19 {dimension_numbers = #tpu.dot_dimension_numbers<[1], [0], [0], [1], [0, 0, 1, 1], [], []>} : vector<16x32xbf16>, vector<32x32xbf16>, vector<16x32xf32> -> vector<16x32xf32>
      %27 = arith.truncf %26 : vector<16x32xf32> to vector<16x32xbf16>
      %c0_20 = arith.constant 0 : index
      %c0_21 = arith.constant 0 : index
      %28 = vector.load %arg10[%c0_20, %c0_21] : memref<16x32xbf16, #tpu.memory_space<vmem>>, vector<16x32xbf16>
      tpu.vector_store %arg10[%c0_20, %c0_21], %27 {strides = array<i32>} : memref<16x32xbf16, #tpu.memory_space<vmem>>, vector<16x32xbf16>,
    } else {
    }
    %c0 = arith.constant 0 : index
    %c0_5 = arith.constant 0 : index
    %10 = vector.load %arg2[%c0, %c0_5] : memref<16x16xbf16, #tpu.memory_space<vmem>>, vector<16x16xbf16>
    %c0_6 = arith.constant 0 : index
    %c0_7 = arith.constant 0 : index
    %11 = vector.load %arg10[%c0_6, %c0_7] : memref<16x32xbf16, #tpu.memory_space<vmem>>, vector<16x32xbf16>
    %cst = arith.constant dense<0.000000e+00> : vector<16x32xf32>
    %12 = tpu.matmul %10, %11, %cst {dimension_numbers = #tpu.dot_dimension_numbers<[1], [0], [0], [1], [0, 0, 1, 1], [], []>} : vector<16x16xbf16>, vector<16x32xbf16>, vector<16x32xf32> -> vector<16x32xf32>
    %c0_8 = arith.constant 0 : index
    %c0_9 = arith.constant 0 : index
    %c0_10 = arith.constant 0 : index
    %13 = vector.load %arg6[%c0_8, %c0_9, %c0_10] : memref<1x1x32xf32, #tpu.memory_space<vmem>>, vector<1x1x32xf32>
    %14 = vector.shape_cast %13 : vector<1x1x32xf32> to vector<1x32xf32>
    %15 = vector.broadcast %14 : vector<1x32xf32> to vector<16x32xf32>
    %16 = arith.addf %12, %15 : vector<16x32xf32>
    %c4_i32 = arith.constant 4 : i32
    %17 = arith.cmpi slt, %arg0, %c4_i32 : i32
    %18 = arith.extui %17 : i1 to i32
    %c0_i32_11 = arith.constant 0 : i32
    %19 = arith.cmpi ne, %18, %c0_i32_11 : i32
    scf.if %19 {
      %c16_i32 = arith.constant 16 : i32
      %23 = arith.muli %arg1, %c16_i32 : i32
      %24 = tpu.assume_multiple %23, 16 : i32
      %cst_14 = arith.constant 0.000000e+00 : f32
      %25 = vector.broadcast %cst_14 : f32 to vector<16x32xf32>
      %26 = arith.maximumf %16, %25 : vector<16x32xf32>
      %27 = arith.truncf %26 : vector<16x32xf32> to vector<16x32xbf16>
      %28 = arith.index_cast %24 : i32 to index
      %c0_15 = arith.constant 0 : index
      %29 = vector.load %arg11[%28, %c0_15] : memref<16x32xbf16, #tpu.memory_space<vmem>>, vector<16x32xbf16>
      tpu.vector_store %arg11[%28, %c0_15], %27 {strides = array<i32>} : memref<16x32xbf16, #tpu.memory_space<vmem>>, vector<16x32xbf16>,
    } else {
    }
    %c4_i32_12 = arith.constant 4 : i32
    %20 = arith.cmpi eq, %arg0, %c4_i32_12 : i32
    %21 = arith.extui %20 : i1 to i32
    %c0_i32_13 = arith.constant 0 : i32
    %22 = arith.cmpi ne, %21, %c0_i32_13 : i32
    scf.if %22 {
      %23 = arith.truncf %16 : vector<16x32xf32> to vector<16x32xbf16>
      %c0_14 = arith.constant 0 : index
      %c0_15 = arith.constant 0 : index
      %24 = vector.load %arg7[%c0_14, %c0_15] : memref<32x128xbf16, #tpu.memory_space<vmem>>, vector<32x128xbf16>
      %cst_16 = arith.constant dense<0.000000e+00> : vector<16x128xf32>
      %25 = tpu.matmul %23, %24, %cst_16 {dimension_numbers = #tpu.dot_dimension_numbers<[1], [0], [0], [1], [0, 0, 1, 1], [], []>} : vector<16x32xbf16>, vector<32x128xbf16>, vector<16x128xf32> -> vector<16x128xf32>
      %c0_17 = arith.constant 0 : index
      %c0_18 = arith.constant 0 : index
      %26 = vector.load %arg8[%c0_17, %c0_18] : memref<1x128xf32, #tpu.memory_space<vmem>>, vector<1x128xf32>
      %27 = vector.broadcast %26 : vector<1x128xf32> to vector<16x128xf32>
      %28 = arith.addf %25, %27 : vector<16x128xf32>
      %c0_19 = arith.constant 0 : index
      %c0_20 = arith.constant 0 : index
      %29 = vector.load %arg9[%c0_19, %c0_20] : memref<16x128xf32, #tpu.memory_space<vmem>>, vector<16x128xf32>
      tpu.vector_store %arg9[%c0_19, %c0_20], %28 {strides = array<i32>} : memref<16x128xf32, #tpu.memory_space<vmem>>, vector<16x128xf32>,
    } else {
    }
    return
  }
  func.func @transform_0(%arg0: i32, %arg1: i32) -> (i32, i32) {
    %c0_i32 = arith.constant 0 : i32
    %c0_i32_0 = arith.constant 0 : i32
    return %arg1, %c0_i32 : i32, i32
  }
  func.func @transform_1(%arg0: i32, %arg1: i32) -> (i32, i32) {
    %c0_i32 = arith.constant 0 : i32
    %c0_i32_0 = arith.constant 0 : i32
    %c0_i32_1 = arith.constant 0 : i32
    return %c0_i32, %c0_i32_0 : i32, i32
  }
  func.func @transform_2(%arg0: i32, %arg1: i32) -> (i32, i32) {
    %c0_i32 = arith.constant 0 : i32
    %c0_i32_0 = arith.constant 0 : i32
    %c0_i32_1 = arith.constant 0 : i32
    return %c0_i32, %c0_i32_0 : i32, i32
  }
  func.func @transform_3(%arg0: i32, %arg1: i32) -> (i32, i32, i32) {
    %c0_i32 = arith.constant 0 : i32
    %c0_i32_0 = arith.constant 0 : i32
    %c0_i32_1 = arith.constant 0 : i32
    return %arg0, %c0_i32, %c0_i32_0 : i32, i32, i32
  }
  func.func @transform_4(%arg0: i32, %arg1: i32) -> (i32, i32, i32) {
    %c0_i32 = arith.constant 0 : i32
    %c0_i32_0 = arith.constant 0 : i32
    %c0_i32_1 = arith.constant 0 : i32
    return %arg0, %c0_i32, %c0_i32_0 : i32, i32, i32
  }
  func.func @transform_5(%arg0: i32, %arg1: i32) -> (i32, i32) {
    %c0_i32 = arith.constant 0 : i32
    %c0_i32_0 = arith.constant 0 : i32
    %c0_i32_1 = arith.constant 0 : i32
    return %c0_i32, %c0_i32_0 : i32, i32
  }
  func.func @transform_6(%arg0: i32, %arg1: i32) -> (i32, i32) {
    %c0_i32 = arith.constant 0 : i32
    %c0_i32_0 = arith.constant 0 : i32
    %c0_i32_1 = arith.constant 0 : i32
    return %c0_i32, %c0_i32_0 : i32, i32
  }
  func.func @transform_7(%arg0: i32, %arg1: i32) -> (i32, i32) {
    %c0_i32 = arith.constant 0 : i32
    %c0_i32_0 = arith.constant 0 : i32
    return %arg1, %c0_i32 : i32, i32
  }
}

</mosaic_0001>

<bundles_post_ra>
// kernel: tpu_custom_call.1
= control target key start
LH: loop header
LB: loop body
LE: loop exit
PB: predicated region body
PF: predicated region fallthrough
CT: control target
= control target key end

     0   :  { %12 = vsyncpa [#allocation5], 0  ;;  %s1344_s0 = inlined_call_operand.vmem [shape: bf16[16,16], index: 0, kind: input, shape index: {}]   ;;  %s1345_s1 = inlined_call_operand.vmem [shape: bf16[16,8], index: 1, kind: input, shape index: {}]   ;;  %s1346_s2 = inlined_call_operand.hbm [shape: bf16[8,32], index: 2, kind: input, shape index: {}]   ;;  %s1347_s3 = inlined_call_operand.hbm [shape: bf16[5,32,32], index: 3, kind: input, shape index: {}]   ;;  %s1348_s4 = inlined_call_operand.vmem [shape: f32[5,1,32], index: 4, kind: input, shape index: {}]   ;;  %s1349_s5 = inlined_call_operand.vmem [shape: bf16[32,128], index: 5, kind: input, shape index: {}]   ;;  %s1350_s6 = inlined_call_operand.vmem [shape: f32[1,128], index: 6, kind: input, shape index: {}]   ;;  %s1351_s7 = inlined_call_operand.hbm [shape: f32[16,128], index: 7, kind: output, shape index: {}]  }
   0x1   :  { %13 = vsyncpa [#allocation8], 0 }
   0x2   :  { %15 = vsyncpa [#allocation8 + $0x1], 0 }
   0x3   :  { %16 = vsyncpa [#allocation6], 0  ;;  %s1110_s24 = smov 0   ;;  %s1112_s25 = smov 0  }
   0x4   :  { %s1114_s26 = smov 0   ;;  %s1116_s27 = smov 0  }
   0x5   :  { %s1118_s28 = smov 0   ;;  %s1120_s29 = smov 0  }
   0x6 LB: > { %s748_s30 = sadd.s32 4294967295, %s1053_s29   ;;  %s109_s8 = sadd.s32 1, %s1041_s26  ;;  %s1053_s29 = sphi %s1120_s29, %s22_s29   ;;  %s1049_s28 = sphi %s1118_s28, %s1372_s28   ;;  %s1045_s27 = sphi %s1116_s27, %s1371_s27   ;;  %s1041_s26 = sphi %s1114_s26, %s1370_s26   ;;  %s1037_s25 = sphi %s1112_s25, %s1369_s25   ;;  %s1033_s24 = sphi %s1110_s24, %s1368_s24  }
   0x7   : > { %p116_p0 = scmp.ne.s32.totalorder %s1041_s26, %s1037_s25  ;;  %p117_p1 = scmp.eq.s32.totalorder %s1053_s29, 0 }
   0x8   : > { %p122_p2 = scmp.ne.s32.totalorder %s1037_s25, %s1033_s24  ;;  %p1146_p3 = scmp.eq.s32.totalorder %s748_s30, 0 }
   0x9   : > { %p118_p4 = por %p117_p1, %p116_p0  ;;  %p749_p5 = scmp.ge.s32.totalorder %s1053_s29, 1 }
   0xa   : > { %s1357_s9 = scalar_select %p1146_p3, 1, 0 }
   0xb   : > { %p1153_p6 = por %p1146_p3, %p122_p2  ;;  %p227_p7 = scmp.lt.s32.totalorder %s1053_s29, 6 }
   0xc   : > { %s1055_s12 = smov [#allocation4]   ;;  %p839_p10 = scmp.lt.s32.totalorder %s1053_s29, 5 }
   0xd   : > { %s1358_s10 = scalar_select %p1153_p6, 1, 0 }
   0xe   : > { %p1158_p8 = pnand %p749_p5, %p227_p7  ;;  %s252_s13 = sshll.u32 %s1055_s12, 4  ;;  %s253_s13 = int_to_ptr.vmem [resolvable:$true] %s252_s13 }
   0xf   : > { %s269_s14 = sand.u32 1, %s1041_s26   ;;  %p1172_p12 = pnand %p839_p10, %p118_p4 }
  0x10   : > { %s1359_s11 = scalar_select %p1158_p8, 1, 0 }
  0x11   : > { %p830_p9 = pneg %p1158_p8  ;;  %s911_s19 = scalar_lea.hbm %s1346_s2, 64 }
  0x12   : > { %s1361_s16 = scalar_select %p1172_p12, 1, 0 }
  0x13   : > { %p1168_p11 = pnand %p830_p9, %p1146_p3  ;;  %p912_p13 = scmp.ne.s32.totalorder %s1346_s2, %s911_s19 }
  0x14   : > { %p918_p5 = scmp.lt.u32.totalorder %s911_s19, %s1346_s2 }
  0x15   : > { %p913_p0 = pneg %p1168_p11 }
  0x17   : > { %p914_p1 = pnand %p913_p0, %p912_p13 }
  0x19   : > { %p915_p2 = pneg %p914_p1 }
  0x1b   : > { %p920_p4 = pnand %p918_p5, %p915_p2 }
  0x1d   : > { %923 = shalt.err (!%p920_p4)
}
  0x1e   : > { %s924_s24 = scalar_lea.vmem %s253_s13, 64  ;;  %p932_p6 = scmp.lt.s32.totalorder %s253_s13, %s253_s13 }
  0x1f   : > { %p925_p7 = scmp.ne.s32.totalorder %s253_s13, %s924_s24  ;;  %p933_p3 = scmp.lt.s32.totalorder %s924_s24, %s924_s24 }
  0x21   : > { %p927_p9 = pnand %p925_p7, %p913_p0  ;;  %p934_p8 = por %p933_p3, %p932_p6 }
  0x23   : > { %p928_p10 = pneg %p927_p9 }
  0x25   : > { %p935_p12 = pnand %p934_p8, %p928_p10 }
  0x27   : > { %938 = shalt.err (!%p935_p12)
}
  0x28   : > { %833 = dma.hbm_to_vmem [thread:$0]  (!%p1168_p11), %s1346_s2, 64, %s253_s13, [#allocation5]  }
  0x29   : > { %s34_s18 = sadd.s32 1, %s1049_s28  ;;  %s753_s19 = sshll.u32 %s269_s14, 4 }
  0x2a   : > { %p36_p13 = scmp.ge.s32.totalorder %s34_s18, 5  ;;  %s779_s20 = sshll.u32 %s1049_s28, 8 }
  0x2b   : > { %s273_s21 = scalar_lea.vmem [#allocation7], %s753_s19  ;;  %s1201_s24 = scalar_lea.hbm %s1347_s3, %s779_s20 }
  0x2c   : > { %s280_s22 = sshll.u32 %s273_s21, 4  ;;  %s1374_s18 = smov (%p36_p13, %s34_s18), 0  ;;  %s1203_s22 = int_to_ptr.vmem [resolvable:$true] %s280_s22 }
  0x2d   : > { %s106_s13 = ssub.s32 %s1049_s28, %s1374_s18  ;;  %s1213_s17 = scalar_lea.sflag [#allocation8], %s269_s14 }
  0x2e   : > { %p1207_p3 = scmp.eq.s32.totalorder %s106_s13, 0  ;;  %s939_s19 = scalar_lea.hbm %s1201_s24, 256 }
  0x2f   : > { %p940_p6 = scmp.ne.s32.totalorder %s1201_s24, %s939_s19  ;;  %p1363_p8 = scmp.ne.s32.totalorder %s1361_s16, 0 }
  0x30   : > { %s944_s15 = scalar_lea.hbm %s1347_s3, 1280  ;;  %p945_p1 = scmp.lt.u32.totalorder %s1201_s24, %s1347_s3 }
  0x31   : > { %p941_p11 = pneg %p1363_p8  ;;  %p946_p2 = scmp.lt.u32.totalorder %s944_s15, %s939_s19 }
  0x32   : > { %p948_p4 = scmp.lt.u32.totalorder %s939_s19, %s1201_s24 }
  0x33   : > { %p942_p12 = pnand %p941_p11, %p940_p6  ;;  %p947_p5 = por %p946_p2, %p945_p1 }
  0x35   : > { %p943_p0 = pneg %p942_p12  ;;  %p949_p7 = por %p948_p4, %p947_p5 }
  0x37   : > { %p950_p9 = pnand %p949_p7, %p943_p0 }
  0x39   : > { %953 = shalt.err (!%p950_p9)
}
  0x3a   : > { %s954_s14 = scalar_lea.vmem %s1203_s22, 256  ;;  %s1056_s20 = smov [#allocation7]  }
  0x3b   : > { %p955_p10 = scmp.ne.s32.totalorder %s1203_s22, %s954_s14  ;;  %s959_s21 = sshll.u32 %s1056_s20, 4  ;;  %s960_s21 = int_to_ptr.vmem [resolvable:$false] %s959_s21 }
  0x3c   : > { %s961_s23 = scalar_lea.vmem %s960_s21, 512  ;;  %p962_p12 = scmp.lt.s32.totalorder %s1203_s22, %s960_s21 }
  0x3d   : > { %p957_p13 = pnand %p955_p10, %p941_p11  ;;  %p963_p1 = scmp.lt.s32.totalorder %s961_s23, %s954_s14 }
  0x3f   : > { %p958_p6 = pneg %p957_p13  ;;  %p964_p2 = por %p963_p1, %p962_p12 }
  0x41   : > { %p965_p5 = pnand %p964_p2, %p958_p6 }
  0x43   : > { %968 = shalt.err (!%p965_p5)
}
  0x44   : > { %s1057_s19 = smov 64   ;;  %s1058_s15 = smov 4  }
  0x45   : > { %837 = dma.hbm_to_vmem [thread:$0]  (!%p1363_p8), %s1201_s24, 256, %s1203_s22, %s1213_s17, %s1057_s19, %s1057_s19, %s1058_s15  }
  0x46   : > { %s1246_s13 = scalar_select %p1207_p3, %s1041_s26, %s109_s8  }
  0x47   : > { %p1364_p11 = scmp.ne.s32.totalorder %s1359_s11, 0 }
  0x48   : > { %p1365_p0 = scmp.ne.s32.totalorder (!%p1364_p11), %s1357_s9, 0 }
  0x49   : > { %298 = sbr.rel (%p1364_p11) target bundleno = 1020 (0x3fc), region = 48 }
  0x50   : > { %1020 = dma.done.wait (%p1365_p0), [#allocation5], 64  }
  0x51   : > { %1022 = vsyncadd (%p1365_p0), [#allocation5], 4294967232  ;;  %s304_s14 = sand.u32 1, %s1037_s25   ;;  %p1366_p8 = scmp.ne.s32.totalorder %s1358_s10, 0 }
  0x52   : > { %s1255_s20 = sshll.u32 %s304_s14, 4  ;;  %s305_s16 = scalar_lea.sflag [#allocation8], %s304_s14 }
  0x53   : > { %s308_s22 = scalar_lea.vmem [#allocation7], %s1255_s20 }
  0x54   : > { %1024 = dma.done.wait (%p1366_p8), %s305_s16, 256  }
  0x55   : > { %1026 = vsyncadd (%p1366_p8), %s305_s16, 4294967040  ;;  %p348_p3 = scmp.lt.s32.totalorder %s1045_s27, 4  ;;  %p353_p4 = scmp.eq.s32.totalorder %s1045_s27, 0 }
  0x56   : > { %v361_v0 = vld [vmem:[#allocation4] sm:$0xf] (%p353_p4)  ;;  %vm371_vm0 = vcmask (%p353_p4), 1043456   ;;  %v1059_v1 = vmov (%p353_p4), 0.0   ;;  %vm1060_vm1 = vmmov (%p353_p4), 0   ;;  %v905_v3 = vld [vmem:[%s1345_s1] sm:$0xff] (%p353_p4)  }
  0x57   : > { %s1265_s8 = scalar_select %p348_p3, %s1045_s27, 4 }
  0x58   : > { %358 = sbr.rel (!%p353_p4) target bundleno = 309 (0x135), region = 60  ;;  %792 = vmatprep.subr.bf16.mxu0 (%p353_p4), %v1059_v1  ;;  %v373_v2 = vsel (%p353_p4), %vm371_vm0, %v361_v0, 0  ;;  %794 = vmatprep.mubr.msk.bf16.mxu0 (%p353_p4), %vm1060_vm1, %v1059_v1  ;;  %vm367_vm2 = vcmask (%p353_p4), 64512   ;;  %vm417_vm3 = vcmask (%p353_p4), 261120  }
  0x59   : > { %s350_s24 = scalar_lea.vmem %s1348_s4, %s1265_s8  ;;  %793 = vmatpush3.bf16.msra.mxu0 (%p353_p4), %v373_v2 }
  0x5c   : > { %795 = vmatmul.mubr.msk.bf16.vlgmr.msra.gmra.mrb[0].mxu0 (%p353_p4), %vm367_vm2, %v905_v3 }
 0x12f   : > { %v409_v4 = vpop.f32.mrb[0].mxu0 }
 0x130   : > { %v796_v5 = vpop.f32.mrb[1].mxu0 }
 0x131   : > { %v412_v6 = vpop.f32.mrb[2].mxu0 }
 0x132   : > { %v416_v7 = vpack.c.bf16 %v412_v6, %v409_v4  ;;  %v797_v8 = vpop.f32.mrb[3].mxu0 }
 0x134   : > { %418 = vst.msk [vmem:[#allocation2] sm:$0xff] %vm417_vm3, %v416_v7 }
 0x135 PF: > { %p419_p7 = scmp.gt.s32.totalorder %s1045_s27, 0 }
 0x136   : > { %v906_v9 = vld [vmem:[%s308_s22] sm:$0xff] (%p419_p7)   ;;  %v1061_v10 = vmov (%p419_p7), 0.0   ;;  %v907_v11 = vld [vmem:[%s308_s22 + $0x8] sm:$0xff] (%p419_p7)   ;;  %vm1062_vm4 = vmmov (%p419_p7), 0   ;;  %vm441_vm5 = vcmask (%p419_p7), 261120  }
 0x137   : > { %423 = sbr.rel (!%p419_p7) target bundleno = 536 (0x218), region = 64  ;;  %798 = vmatprep.subr.bf16.mxu0 (%p419_p7), %v1061_v10  ;;  %802 = vmatprep.mubr.msk.bf16.mxu0 (%p419_p7), %vm1062_vm4, %v1061_v10  ;;  %v424_v12 = vld [vmem:[#allocation3] sm:$0xff] (%p419_p7) }
 0x138   : > { %799 = vmatpush3.bf16.msra.mxu0 (%p419_p7), %v906_v9 }
 0x139   : > { %800 = vmatprep.subr.bf16.mxu0 (%p419_p7), %v1061_v10 }
 0x13c   : > { %801 = vmatpush3.bf16.msra.mxu0 (%p419_p7), %v907_v11 }
 0x13f   : > { %803 = vmatmul.mubr.msk.bf16.vlgmr.msra.gmra.mrb[0].mxu0 %vm441_vm5, %v424_v12 }
 0x212   : > { %v479_v13 = vpop.f32.mrb[0].mxu0 }
 0x213   : > { %v804_v14 = vpop.f32.mrb[1].mxu0 }
 0x214   : > { %v482_v15 = vpop.f32.mrb[2].mxu0 }
 0x215   : > { %v486_v16 = vpack.c.bf16 %v482_v15, %v479_v13  ;;  %v805_v17 = vpop.f32.mrb[3].mxu0 }
 0x217   : > { %487 = vst.msk [vmem:[#allocation2] sm:$0xff] %vm441_vm5, %v486_v16 }
 0x218 PF: > { %v1063_v19 = vmov 0.0   ;;  %vm1064_vm6 = vmmov 0   ;;  %v908_v20 = vld [vmem:[%s1344_s0] sm:$0xff]   ;;  %vm503_vm7 = vcmask 130048   ;;  %p769_p9 = scmp.ge.s32.totalorder %s1045_s27, 4 }
 0x219   : > { %806 = vmatprep.subr.bf16.mxu0 %v1063_v19  ;;  %808 = vmatprep.mubr.msk.bf16.mxu0 %vm1064_vm6, %v1063_v19  ;;  %v766_v21 = vld [vmem:[%s350_s24] ss:$0 sm:$0xff]  ;;  %vm560_vm8 = vcmask (!%p769_p9), 261120  }
 0x21e   : > { %v490_v18 = vld [vmem:[#allocation2] sm:$0xff] }
 0x21f   : > { %807 = vmatpush3.bf16.msra.mxu0 %v490_v18 }
 0x222   : > { %809 = vmatmul.mubr.msk.bf16.vlgmr.msra.gmra.mrb[0].mxu0 %vm503_vm7, %v908_v20 }
 0x2f2   : > { %551 = sbr.rel (%p769_p9) target bundleno = 767 (0x2ff), region = 68 }
 0x2f5   : > { %v541_v22 = vpop.f32.mrb[0].mxu0 }
 0x2f6   : > { %v542_v23 = vadd.f32 %v766_v21, %v541_v22  ;;  %v810_v24 = vpop.f32.mrb[1].mxu0 }
 0x2f7   : > { %v544_v25 = vpop.f32.mrb[2].mxu0 }
 0x2f8   : > { %v545_v26 = vadd.f32 %v766_v21, %v544_v25  ;;  %v811_v27 = vpop.f32.mrb[3].mxu0  ;;  %v553_v28 = vmax.f32 (!%p769_p9), %v542_v23, 0.0 }
 0x2fa   : > { %v554_v29 = vmax.f32 %v545_v26, 0.0 }
 0x2fc   : > { %v555_v30 = vpack.c.bf16 %v554_v29, %v553_v28 }
 0x2fe   : > { %561 = vst.msk [vmem:[#allocation3] sm:$0xff] %vm560_vm8, %v555_v30 }
 0x2ff PF: > { %p770_p10 = scmp.ne.s32.totalorder %s1045_s27, 4 }
 0x300   : > { %v909_v31 = vld [vmem:[%s1349_s5] sm:$0xff] (!%p770_p10)   ;;  %v1065_v32 = vmov (!%p770_p10), 0.0   ;;  %v910_v33 = vld [vmem:[%s1349_s5 + $0x8] sm:$0xff] (!%p770_p10)   ;;  %vm1066_vm9 = vmmov (!%p770_p10), 0   ;;  %v566_v34 = vpack.c.bf16 (!%p770_p10), %v545_v26, %v542_v23  ;;  %vm590_vm10 = vcmask (!%p770_p10), 261120  }
 0x301   : > { %565 = sbr.rel (%p770_p10) target bundleno = 994 (0x3e2), region = 72  ;;  %812 = vmatprep.subr.bf16.mxu0 (!%p770_p10), %v1065_v32  ;;  %816 = vmatprep.mubr.msk.bf16.mxu0 (!%p770_p10), %vm1066_vm9, %v1065_v32  ;;  %v771_v35 = vld [vmem:[%s1350_s6] ss:$0 sm:$0xff] (!%p770_p10) }
 0x302   : > { %813 = vmatpush3.bf16.msra.mxu0 (!%p770_p10), %v909_v31 }
 0x303   : > { %814 = vmatprep.subr.bf16.mxu0 (!%p770_p10), %v1065_v32 }
 0x306   : > { %815 = vmatpush3.bf16.msra.mxu0 (!%p770_p10), %v910_v33 }
 0x309   : > { %817 = vmatmul.mubr.msk.bf16.vlgmr.msra.gmra.mrb[0].mxu0 %vm590_vm10, %v566_v34 }
 0x3dc   : > { %v628_v36 = vpop.f32.mrb[0].mxu0 }
 0x3dd   : > { %v629_v37 = vadd.f32 %v771_v35, %v628_v36  ;;  %v818_v38 = vpop.f32.mrb[1].mxu0 }
 0x3de   : > { %v631_v39 = vpop.f32.mrb[2].mxu0 }
 0x3df   : > { %635 = vst [vmem:[#allocation9] sm:$0xff] %v629_v37  ;;  %v632_v40 = vadd.f32 %v771_v35, %v631_v39  ;;  %v819_v41 = vpop.f32.mrb[3].mxu0 }
 0x3e1   : > { %636 = vst [vmem:[#allocation9 + $0x8] sm:$0xff] %v632_v40 }
 0x3e2 PF: > { %p1300_p13 = scmp.eq.s32.totalorder %s748_s30, 4  ;;  %s1067_s9 = smov [#allocation9]  }
 0x3e3   : > { %s646_s11 = sshll.u32 %s1067_s9, 4  ;;  %s647_s11 = int_to_ptr.vmem [resolvable:$true] %s646_s11 }
 0x3e4   : > { %s969_s24 = scalar_lea.vmem %s647_s11, 256  ;;  %p976_p2 = scmp.lt.s32.totalorder %s647_s11, %s647_s11 }
 0x3e5   : > { %p970_p6 = scmp.ne.s32.totalorder %s647_s11, %s969_s24  ;;  %p977_p5 = scmp.lt.s32.totalorder %s969_s24, %s969_s24 }
 0x3e7   : > { %p971_p12 = pnand %p970_p6, %p1300_p13  ;;  %p978_p11 = por %p977_p5, %p976_p2 }
 0x3e9   : > { %p972_p1 = pneg %p971_p12 }
 0x3eb   : > { %p979_p0 = pnand %p978_p11, %p972_p1 }
 0x3ed   : > { %982 = shalt.err (!%p979_p0)
}
 0x3ee   : > { %s983_s30 = scalar_lea.hbm %s1351_s7, 256 }
 0x3ef   : > { %p984_p8 = scmp.ne.s32.totalorder %s1351_s7, %s983_s30  ;;  %p989_p7 = scmp.lt.u32.totalorder %s983_s30, %s1351_s7 }
 0x3f1   : > { %p985_p3 = pnand %p984_p8, %p1300_p13 }
 0x3f3   : > { %p986_p4 = pneg %p985_p3 }
 0x3f5   : > { %p991_p9 = pnand %p989_p7, %p986_p4 }
 0x3f7   : > { %994 = shalt.err (!%p991_p9)
}
 0x3f8   : > { %s1068_s15 = smov 128   ;;  %s1069_s14 = smov 8  }
 0x3f9   : > { %827 = dma.vmem_to_hbm [thread:$0]  (%p1300_p13), %s647_s11, 256, %s1351_s7, [#allocation6], %s1068_s15, %s1068_s15, %s1069_s14  }
 0x3fa   : > { %1028 = dma.done.wait (%p1300_p13), [#allocation6], 256  }
 0x3fb   : > { %1030 = vsyncadd (%p1300_p13), [#allocation6], 4294967040 }
 0x3fc PF: > { %s22_s29 = sadd.s32 1, %s1053_s29   ;;  %s1368_s24 = smov %s1037_s25 }
 0x3fd   : > { %p19_p10 = scmp.ge.s32.totalorder %s22_s29, 7   ;;  %s1369_s25 = smov %s1041_s26 }
 0x3fe   : > { %s1370_s26 = smov %s1246_s13  ;;  %s1371_s27 = smov %s1049_s28 }
 0x3ff   : > { %s1372_s28 = smov %s1374_s18  ;;  %21 = sbr.rel (!%p19_p10) target bundleno = 6 (0x6), region = 114 }
 0x406   :  { %662 = vsyncpa [#allocation5], 1 }
 0x407   :  { %664 = vsyncpa [#allocation5 + $0x1], 1 }
 0x408   :  { %665 = vsyncpa [#allocation8], 1 }
 0x409   :  { %667 = vsyncpa [#allocation8 + $0x1], 1 }
 0x40a   :  { %668 = vsyncpa [#allocation6], 1 }
 0x40b   :  { %670 = vsyncpa [#allocation6 + $0x1], 1 }

</bundles_post_ra>
